<compile_context>
chip_gen: v7x
topology: tpu7x:2x2x1
jax: 0.10.0
libtpu: 0.0.40
codegen_flags: <defaults>
</compile_context>

<pallas_src>
import functools

import jax
import jax.numpy as jnp
from jax.experimental import pallas as pl
from jax.experimental.pallas import tpu as pltpu


def _inlayer_kernel(n_cat, n_cont, *refs):
    """One batch tile per grid step.

    refs = (cat_ref, num_ref, w_ref, bias_ref, *table_refs, x_ref)
      cat_ref : (TILE_B, n_cat) int32
      num_ref : (TILE_B, n_cont) f32
      w_ref   : (n_cont, E) f32   (PyTorch weight pre-transposed)
      bias_ref: (1, E) f32
      table_i : (V_i, E) f32
      x_ref   : (TILE_B, (n_cat+1)*E) f32  -- flattened concat output
    """
    cat_ref, num_ref, w_ref, bias_ref = refs[:4]
    table_refs = refs[4:4 + n_cat]
    x_ref = refs[4 + n_cat]

    tile_b = cat_ref.shape[0]
    E = w_ref.shape[-1]

    cat = cat_ref[...]                      # (TILE_B, n_cat) int32
    pieces = []

    # --- embedding lookups: vectorized one-hot matmul per table (MXU) -------
    for i in range(n_cat):                  # n_cat is small; static unroll
        table = table_refs[i][...]          # (V_i, E)
        V = table.shape[0]
        ids = cat[:, i:i + 1]               # (TILE_B, 1)
        iota = jax.lax.broadcasted_iota(jnp.int32, (tile_b, V), 1)
        onehot = (ids == iota).astype(jnp.float32)          # (TILE_B, V_i)
        pieces.append(
            jnp.dot(onehot, table, preferred_element_type=jnp.float32))

    # --- continuous linear on the VPU: y = num @ W + b (K = n_cont tiny) ----
    num = num_ref[...]                      # (TILE_B, n_cont)
    w = w_ref[...]                          # (n_cont, E)
    y = num[:, 0:1] * w[0:1, :]             # (TILE_B, E) via broadcast
    for j in range(1, n_cont):
        y = y + num[:, j:j + 1] * w[j:j + 1, :]
    y = y + bias_ref[...]                   # (1, E) broadcast
    pieces.append(y)

    # --- single lane-dense slab store (== torch.cat([...], dim=-1)) ---------
    x_ref[...] = jnp.concatenate(pieces, axis=-1)


def in_layer_forward(cat, num, constraints, tables, w, bias, *, tile_b=512):
    """JAX wrapper mirroring InLayer.forward((cat, num), constraints).

    `w` is the nn.Linear weight pre-transposed to [n_cont, E]; `bias` is [E].
    Returns (x: [B, (n_cat+1)*E] f32, lengths: [B] int32).
    """
    if constraints.ndim == 3:
        # matches `constraints.squeeze(1)`; constraints are otherwise unused
        constraints = jnp.squeeze(constraints, axis=1)

    B, n_cat = cat.shape
    n_cont = num.shape[-1]
    assert n_cont > 0, "kernel assumes the continuous branch exists"
    E = w.shape[-1]
    for t in tables:
        assert t.shape[-1] == E, "table embedding dim must match linear out dim"

    out_dim = (n_cat + 1) * E

    # lengths: trivial reduction — plain jnp (torch did a host .item() loop)
    lengths = jnp.sum(cat != 0, axis=-1).astype(jnp.int32)

    # safety: clamp ids to valid range (torch would raise on OOB ids)
    max_ids = jnp.array([t.shape[0] - 1 for t in tables], jnp.int32)
    cat = jnp.clip(cat, 0, max_ids[None, :]).astype(jnp.int32)

    # batch tiling: big tiles amortize per-step overhead; pad B if needed
    TILE_B = B if B <= tile_b else tile_b
    B_pad = pl.cdiv(B, TILE_B) * TILE_B
    if B_pad != B:
        cat = jnp.pad(cat, ((0, B_pad - B), (0, 0)))      # pad ids = 0 (valid)
        num = jnp.pad(num, ((0, B_pad - B), (0, 0)))

    kernel = functools.partial(_inlayer_kernel, n_cat, n_cont)

    grid_spec = pltpu.PrefetchScalarGridSpec(
        num_scalar_prefetch=0,
        grid=(B_pad // TILE_B,),
        in_specs=(
            [pl.BlockSpec((TILE_B, n_cat), lambda b: (b, 0)),      # cat ids
             pl.BlockSpec((TILE_B, n_cont), lambda b: (b, 0)),     # num
             pl.BlockSpec((n_cont, E), lambda b: (0, 0)),          # W (pre-T)
             pl.BlockSpec((1, E), lambda b: (0, 0))]               # bias
            + [pl.BlockSpec(t.shape, lambda b: (0, 0))             # tables
               for t in tables]
        ),
        out_specs=pl.BlockSpec((TILE_B, out_dim), lambda b: (b, 0)),
    )

    x = pl.pallas_call(
        kernel,
        grid_spec=grid_spec,
        out_shape=jax.ShapeDtypeStruct((B_pad, out_dim), jnp.float32),
        compiler_params=pltpu.CompilerParams(
            dimension_semantics=("parallel",)),   # megacore-shardable on v7x
    )(cat, num, w, bias.reshape(1, E), *tables)

    return x[:B], lengths


if __name__ == "__main__":
    # Small config implied by __init__: vocabs of sizes [11, 7, 13],
    # n_continuous=2, n_constraints=3, embedding_size=40
    #   -> n_features = 5, per-feature dim E = 40 // 5 = 8.
    cat_dims = [11, 7, 13]
    n_cat = len(cat_dims)
    n_cont = 2
    n_constraints = 3
    embedding_size = 40
    n_features = n_cat + n_cont
    E = embedding_size // n_features
    B = 4

    key = jax.random.PRNGKey(0)
    keys = jax.random.split(key, 8)

    # nn.Embedding weights [V, E], xavier_uniform-style synthetic init
    tables = []
    for i, V in enumerate(cat_dims):
        bound = (6.0 / (V + E)) ** 0.5
        tables.append(
            jax.random.uniform(keys[i], (V, E), jnp.float32, -bound, bound))

    # nn.Linear(n_cont, E): weight [E, n_cont] (PyTorch layout), bias [E]
    bound_w = (6.0 / (n_cont + E)) ** 0.5
    w_torch = jax.random.uniform(keys[3], (E, n_cont), jnp.float32,
                                 -bound_w, bound_w)
    w = w_torch.T                                   # [n_cont, E] for num @ W
    bias = jax.random.uniform(keys[4], (E,), jnp.float32, -0.5, 0.5)

    # inputs: cat ids in [0, V_i), continuous features, (unused) constraints
    cat = jax.random.randint(keys[5], (B, n_cat), 0, max(cat_dims),
                             dtype=jnp.int32)
    cat = jnp.minimum(cat, jnp.array(cat_dims, jnp.int32)[None, :] - 1)
    num = jax.random.normal(keys[6], (B, n_cont), jnp.float32)
    constraints = jax.random.normal(keys[7], (B, 1, n_constraints), jnp.float32)

    x, lengths = in_layer_forward(cat, num, constraints, tables, w, bias)
    x = jax.block_until_ready(x)
    lengths = jax.block_until_ready(lengths)

    # plain-JAX reference (same math as the PyTorch forward)
    ref_x = jnp.concatenate(
        [tables[i][cat[:, i]] for i in range(n_cat)] + [num @ w + bias[None, :]],
        axis=-1)
    ref_len = jnp.sum(cat != 0, axis=-1).astype(jnp.int32)

    assert x.shape == (B, (n_cat + 1) * E)
    assert jnp.allclose(x, ref_x, atol=1e-5), "embedding/linear mismatch"
    assert jnp.array_equal(lengths, ref_len), "lengths mismatch"
    print("KERNEL_OK")
</pallas_src>

<mosaic_0001>
module attributes {stable_mosaic.version = 11 : i64} {
  func.func @_inlayer_kernel(%arg0: i32, %arg1: memref<4x3xi32, #tpu.memory_space<vmem>>, %arg2: memref<4x2xf32, #tpu.memory_space<vmem>>, %arg3: memref<2x8xf32, #tpu.memory_space<vmem>>, %arg4: memref<1x8xf32, #tpu.memory_space<vmem>>, %arg5: memref<11x8xf32, #tpu.memory_space<vmem>>, %arg6: memref<7x8xf32, #tpu.memory_space<vmem>>, %arg7: memref<13x8xf32, #tpu.memory_space<vmem>>, %arg8: memref<4x32xf32, #tpu.memory_space<vmem>>) attributes {dimension_semantics = [#tpu.dimension_semantics<parallel>], iteration_bounds = array<i64: 1>, scalar_prefetch = 0 : i64, scratch_operands = 0 : i64, tpu.core_type = #tpu.core_type<tc>, window_params = [{transform_indices = @transform_0, window_bounds = array<i64: 4, 3>}, {transform_indices = @transform_1, window_bounds = array<i64: 4, 2>}, {pipeline_mode = #tpu.pipeline_mode<synchronous>, transform_indices = @transform_2, window_bounds = array<i64: 2, 8>}, {pipeline_mode = #tpu.pipeline_mode<synchronous>, transform_indices = @transform_3, window_bounds = array<i64: 1, 8>}, {pipeline_mode = #tpu.pipeline_mode<synchronous>, transform_indices = @transform_4, window_bounds = array<i64: 11, 8>}, {pipeline_mode = #tpu.pipeline_mode<synchronous>, transform_indices = @transform_5, window_bounds = array<i64: 7, 8>}, {pipeline_mode = #tpu.pipeline_mode<synchronous>, transform_indices = @transform_6, window_bounds = array<i64: 13, 8>}, {transform_indices = @transform_7, window_bounds = array<i64: 4, 32>}]} {
    %c0 = arith.constant 0 : index
    %c0_0 = arith.constant 0 : index
    %0 = vector.load %arg1[%c0, %c0_0] : memref<4x3xi32, #tpu.memory_space<vmem>>, vector<4x3xi32>
    %c0_1 = arith.constant 0 : index
    %c0_2 = arith.constant 0 : index
    %1 = vector.load %arg5[%c0_1, %c0_2] : memref<11x8xf32, #tpu.memory_space<vmem>>, vector<11x8xf32>
    %2 = vector.extract_strided_slice %0 {offsets = [0, 0], sizes = [4, 1], strides = [1, 1]} : vector<4x3xi32> to vector<4x1xi32>
    %3 = tpu.iota {dimensions = array<i32: 1>} : vector<4x11xi32>
    %4 = vector.broadcast %2 : vector<4x1xi32> to vector<4x11xi32>
    %5 = arith.cmpi eq, %4, %3 : vector<4x11xi32>
    %6 = arith.extui %5 : vector<4x11xi1> to vector<4x11xi32>
    %7 = arith.sitofp %6 : vector<4x11xi32> to vector<4x11xf32>
    %cst = arith.constant dense<0.000000e+00> : vector<4x8xf32>
    %8 = tpu.matmul %7, %1, %cst {dimension_numbers = #tpu.dot_dimension_numbers<[1], [0], [0], [1], [0, 0, 1, 1], [], []>} : vector<4x11xf32>, vector<11x8xf32>, vector<4x8xf32> -> vector<4x8xf32>
    %c0_3 = arith.constant 0 : index
    %c0_4 = arith.constant 0 : index
    %9 = vector.load %arg6[%c0_3, %c0_4] : memref<7x8xf32, #tpu.memory_space<vmem>>, vector<7x8xf32>
    %10 = vector.extract_strided_slice %0 {offsets = [0, 1], sizes = [4, 1], strides = [1, 1]} : vector<4x3xi32> to vector<4x1xi32>
    %11 = tpu.iota {dimensions = array<i32: 1>} : vector<4x7xi32>
    %12 = vector.broadcast %10 : vector<4x1xi32> to vector<4x7xi32>
    %13 = arith.cmpi eq, %12, %11 : vector<4x7xi32>
    %14 = arith.extui %13 : vector<4x7xi1> to vector<4x7xi32>
    %15 = arith.sitofp %14 : vector<4x7xi32> to vector<4x7xf32>
    %cst_5 = arith.constant dense<0.000000e+00> : vector<4x8xf32>
    %16 = tpu.matmul %15, %9, %cst_5 {dimension_numbers = #tpu.dot_dimension_numbers<[1], [0], [0], [1], [0, 0, 1, 1], [], []>} : vector<4x7xf32>, vector<7x8xf32>, vector<4x8xf32> -> vector<4x8xf32>
    %c0_6 = arith.constant 0 : index
    %c0_7 = arith.constant 0 : index
    %17 = vector.load %arg7[%c0_6, %c0_7] : memref<13x8xf32, #tpu.memory_space<vmem>>, vector<13x8xf32>
    %18 = vector.extract_strided_slice %0 {offsets = [0, 2], sizes = [4, 1], strides = [1, 1]} : vector<4x3xi32> to vector<4x1xi32>
    %19 = tpu.iota {dimensions = array<i32: 1>} : vector<4x13xi32>
    %20 = vector.broadcast %18 : vector<4x1xi32> to vector<4x13xi32>
    %21 = arith.cmpi eq, %20, %19 : vector<4x13xi32>
    %22 = arith.extui %21 : vector<4x13xi1> to vector<4x13xi32>
    %23 = arith.sitofp %22 : vector<4x13xi32> to vector<4x13xf32>
    %cst_8 = arith.constant dense<0.000000e+00> : vector<4x8xf32>
    %24 = tpu.matmul %23, %17, %cst_8 {dimension_numbers = #tpu.dot_dimension_numbers<[1], [0], [0], [1], [0, 0, 1, 1], [], []>} : vector<4x13xf32>, vector<13x8xf32>, vector<4x8xf32> -> vector<4x8xf32>
    %c0_9 = arith.constant 0 : index
    %c0_10 = arith.constant 0 : index
    %25 = vector.load %arg2[%c0_9, %c0_10] : memref<4x2xf32, #tpu.memory_space<vmem>>, vector<4x2xf32>
    %c0_11 = arith.constant 0 : index
    %c0_12 = arith.constant 0 : index
    %26 = vector.load %arg3[%c0_11, %c0_12] : memref<2x8xf32, #tpu.memory_space<vmem>>, vector<2x8xf32>
    %27 = vector.extract_strided_slice %25 {offsets = [0, 0], sizes = [4, 1], strides = [1, 1]} : vector<4x2xf32> to vector<4x1xf32>
    %28 = vector.extract_strided_slice %26 {offsets = [0, 0], sizes = [1, 8], strides = [1, 1]} : vector<2x8xf32> to vector<1x8xf32>
    %29 = vector.broadcast %27 : vector<4x1xf32> to vector<4x8xf32>
    %30 = vector.broadcast %28 : vector<1x8xf32> to vector<4x8xf32>
    %31 = arith.mulf %29, %30 : vector<4x8xf32>
    %32 = vector.extract_strided_slice %25 {offsets = [0, 1], sizes = [4, 1], strides = [1, 1]} : vector<4x2xf32> to vector<4x1xf32>
    %33 = vector.extract_strided_slice %26 {offsets = [1, 0], sizes = [1, 8], strides = [1, 1]} : vector<2x8xf32> to vector<1x8xf32>
    %34 = vector.broadcast %32 : vector<4x1xf32> to vector<4x8xf32>
    %35 = vector.broadcast %33 : vector<1x8xf32> to vector<4x8xf32>
    %36 = arith.mulf %34, %35 : vector<4x8xf32>
    %37 = arith.addf %31, %36 : vector<4x8xf32>
    %c0_13 = arith.constant 0 : index
    %c0_14 = arith.constant 0 : index
    %38 = vector.load %arg4[%c0_13, %c0_14] : memref<1x8xf32, #tpu.memory_space<vmem>>, vector<1x8xf32>
    %39 = vector.broadcast %38 : vector<1x8xf32> to vector<4x8xf32>
    %40 = arith.addf %37, %39 : vector<4x8xf32>
    %41 = tpu.concatenate %8, %16, %24, %40 in 1 : vector<4x8xf32>, vector<4x8xf32>, vector<4x8xf32>, vector<4x8xf32> -> vector<4x32xf32>
    %c0_15 = arith.constant 0 : index
    %c0_16 = arith.constant 0 : index
    %42 = vector.load %arg8[%c0_15, %c0_16] : memref<4x32xf32, #tpu.memory_space<vmem>>, vector<4x32xf32>
    tpu.vector_store %arg8[%c0_15, %c0_16], %41 {strides = array<i32>} : memref<4x32xf32, #tpu.memory_space<vmem>>, vector<4x32xf32>,
    return
  }
  func.func @transform_0(%arg0: i32) -> (i32, i32) {
    %c0_i32 = arith.constant 0 : i32
    %c0_i32_0 = arith.constant 0 : i32
    return %arg0, %c0_i32 : i32, i32
  }
  func.func @transform_1(%arg0: i32) -> (i32, i32) {
    %c0_i32 = arith.constant 0 : i32
    %c0_i32_0 = arith.constant 0 : i32
    return %arg0, %c0_i32 : i32, i32
  }
  func.func @transform_2(%arg0: i32) -> (i32, i32) {
    %c0_i32 = arith.constant 0 : i32
    %c0_i32_0 = arith.constant 0 : i32
    %c0_i32_1 = arith.constant 0 : i32
    return %c0_i32, %c0_i32_0 : i32, i32
  }
  func.func @transform_3(%arg0: i32) -> (i32, i32) {
    %c0_i32 = arith.constant 0 : i32
    %c0_i32_0 = arith.constant 0 : i32
    %c0_i32_1 = arith.constant 0 : i32
    return %c0_i32, %c0_i32_0 : i32, i32
  }
  func.func @transform_4(%arg0: i32) -> (i32, i32) {
    %c0_i32 = arith.constant 0 : i32
    %c0_i32_0 = arith.constant 0 : i32
    %c0_i32_1 = arith.constant 0 : i32
    return %c0_i32, %c0_i32_0 : i32, i32
  }
  func.func @transform_5(%arg0: i32) -> (i32, i32) {
    %c0_i32 = arith.constant 0 : i32
    %c0_i32_0 = arith.constant 0 : i32
    %c0_i32_1 = arith.constant 0 : i32
    return %c0_i32, %c0_i32_0 : i32, i32
  }
  func.func @transform_6(%arg0: i32) -> (i32, i32) {
    %c0_i32 = arith.constant 0 : i32
    %c0_i32_0 = arith.constant 0 : i32
    %c0_i32_1 = arith.constant 0 : i32
    return %c0_i32, %c0_i32_0 : i32, i32
  }
  func.func @transform_7(%arg0: i32) -> (i32, i32) {
    %c0_i32 = arith.constant 0 : i32
    %c0_i32_0 = arith.constant 0 : i32
    return %arg0, %c0_i32 : i32, i32
  }
}

</mosaic_0001>

<bundles_post_ra>
// kernel: tpu_custom_call.1
= control target key start
LH: loop header
LB: loop body
LE: loop exit
PB: predicated region body
PF: predicated region fallthrough
CT: control target
= control target key end

     0   :  { %v436_v1 = vmov 1   ;;  %v437_v2 = vmov 0   ;;  %s531_s0 = inlined_call_operand.vmem [shape: s32[4,3], index: 0, kind: input, shape index: {}]   ;;  %s532_s1 = inlined_call_operand.vmem [shape: f32[4,2], index: 1, kind: input, shape index: {}]   ;;  %s533_s2 = inlined_call_operand.vmem [shape: f32[2,8], index: 2, kind: input, shape index: {}]   ;;  %s534_s3 = inlined_call_operand.vmem [shape: f32[1,8], index: 3, kind: input, shape index: {}]   ;;  %s535_s4 = inlined_call_operand.vmem [shape: f32[11,8], index: 4, kind: input, shape index: {}]   ;;  %s536_s5 = inlined_call_operand.vmem [shape: f32[7,8], index: 5, kind: input, shape index: {}]   ;;  %s537_s6 = inlined_call_operand.vmem [shape: f32[13,8], index: 6, kind: input, shape index: {}]   ;;  %s538_s7 = inlined_call_operand.hbm [shape: f32[4,32], index: 7, kind: output, shape index: {}]  }
   0x1   :  { %v27_v0 = vld [vmem:[%s531_s0] sm:$0xf]  ;;  %407 = vset.pattern.permute.xlu0 %v436_v1  ;;  %409 = vset.pattern.permute.xlu1 %v437_v2 }
   0x2   :  { %12 = vsyncpa [#allocation3], 0  ;;  %118 = vperm.xlu0 %407, %v27_v0   ;;  %33 = vperm.xlu1 %409, %v27_v0   ;;  %v116_v3 = vld [vmem:[%s536_s5] sm:$0x7f]  ;;  %vm127_vm0 = vcmask 1046528   ;;  %v438_v5 = vmov 0.0   ;;  %v30_v11 = vlaneseq }
   0x3   :  { %v287_v4 = vld [vmem:[%s532_s1] sm:$0xf]  ;;  %376 = vmatprep.subr.mxu1 %v438_v5  ;;  %vm439_vm1 = vmmov 0   ;;  %v440_v6 = vmov 0.0|0.0   ;;  %v441_v7 = vmov 2   ;;  %vm42_vm2 = vcmask 1042432  }
   0x4   :  { %378 = vmatprep.mubr.msk.f32.mxu1 %vm439_vm1, %v438_v5  ;;  %377 = vmatpush3.msk.msra.mxu1 %vm127_vm0, %v116_v3  ;;  %v28_v8 = vld [vmem:[%s535_s4] sm:$0xff]  ;;  %v29_v9 = vld [vmem:[%s535_s4 + $0x8] sm:$0x7]  ;;  %vm442_vm3 = vmmov 1   ;;  %v31_v12 = vand.u32 127, %v30_v11  ;;  %vm213_vm5 = vcmask 1044480  }
   0x5   :  { %373 = vmatprep.mubr.msk.f32.mxu0 %vm439_vm1, %v438_v5  ;;  %392 = vmatprep.subr.bf16.mxu1 %v440_v6  ;;  %v389_v10 = vpack.c.bf16 %v29_v9, %v28_v8  ;;  %vm390_vm4 = vmpackc.low %vm42_vm2, %vm442_vm3  ;;  %v201_v13 = vld [vmem:[%s537_s6] sm:$0xff]  ;;  %v202_v14 = vld [vmem:[%s537_s6 + $0x8] sm:$0x1f]  ;;  %vm123_vm6 = vcmask 56320   ;;  %vm38_vm7 = vcmask 89088   ;;  %vm209_vm11 = vcmask 105472  }
   0x6   :  { %388 = vmatprep.subr.bf16.mxu0 %v440_v6  ;;  %408 = vset.pattern.permute.xlu0 %v441_v7  ;;  %v393_v16 = vpack.c.bf16 %v202_v14, %v201_v13  ;;  %vm394_vm9 = vmpackc.low %vm213_vm5, %vm442_vm3  ;;  %v295_v22 = vshrl.u32 %v30_v11, 7  ;;  %v288_v26 = vld [vmem:[%s533_s2] sm:$0x3]  ;;  %s443_s14 = smov 8   ;;  %s444_s15 = smov 24   ;;  %vm329_vm13 = vcmask 64512  }
   0x7   :  { %291 = vperm.xlu1 %409, %v287_v4   ;;  %204 = vperm.xlu0 %408, %v27_v0   ;;  %v360_v34 = vld [vmem:[%s534_s3] ss:$0 sm:$0xff]  ;;  %s445_s2 = smov 16   ;;  %vm331_vm14 = vcmask 130048   ;;  %s446_s16 = smov [#allocation2]   ;;  %vm333_vm15 = vcmask 195584  }
   0x8   :  { %391 = vmatpush3.bf16.msk.msra.mxu0 %vm390_vm4, %v389_v10  ;;  %v296_v24 = vsub.s32 0, %v295_v22  ;;  %v305_v25 = vsub.s32 1, %v295_v22  ;;  %s343_s17 = sshll.u32 %s446_s16, 4  ;;  %vm335_vm0 = vcmask 257024   ;;  %s344_s17 = int_to_ptr.vmem [resolvable:$true] %s343_s17 }
   0x9   :  { %s412_s3 = scalar_lea.vmem %s344_s17, 64  ;;  %p417_p1 = scmp.lt.s32.totalorder %s344_s17, %s344_s17 }
   0xa   :  { %v297_v27 = vrot.slane %v288_v26, %v296_v24  ;;  %v306_v28 = vrot.slane %v288_v26, %v305_v25  ;;  %p413_p0 = scmp.ne.s32.totalorder %s344_s17, %s412_s3  ;;  %p418_p2 = scmp.lt.s32.totalorder %s412_s3, %s412_s3 }
   0xb   :  { %410 = vset.pattern.permute.xlu1 %v436_v1  ;;  %411 = vset.pattern.permute.xlu0 %v436_v1 }
   0xc   :  { %300 = vperm.xlu1 %410, %v287_v4   ;;  %p419_p3 = por %p418_p2, %p417_p1 }
   0xe   :  { %p420_p4 = pnand %p419_p3, %p413_p0 }
  0x81   :  { %v119_v15 = vpop.permute.xlu0 %118  ;;  %v34_v17 = vpop.permute.xlu1 %33 }
  0x82   :  { %vm120_vm8 = vcmp.eq.s32.totalorder %v119_v15, %v31_v12  ;;  %vm35_vm10 = vcmp.eq.s32.totalorder %v34_v17, %v31_v12 }
  0x83   :  { %v354_v18 = vsel %vm120_vm8, 1.0, %v438_v5  ;;  %v351_v19 = vsel %vm35_vm10, 1.0, %v438_v5 }
  0x84   :  { %379 = vmatmul.mubr.msk.f32.vlgmr.msra.gmra.mrb[0].mxu1 %vm123_vm6, %v354_v18  ;;  %374 = vmatmul.mubr.msk.f32.vlgmr.msra.gmra.mrb[0].mxu0 %vm38_vm7, %v351_v19 }
  0x85   :  { %395 = vmatpush3.bf16.msk.msra.mxu1 %vm394_vm9, %v393_v16  ;;  %385 = vmatprep.mubr.msk.f32.mxu1 %vm439_vm1, %v438_v5 }
  0x86   :  { %v205_v20 = vpop.permute.xlu0 %204  ;;  %v292_v23 = vpop.permute.xlu1 %291 }
  0x87   :  { %vm206_vm12 = vcmp.eq.s32.totalorder %v205_v20, %v31_v12  ;;  %v298_v30 = vmul.f32 %v297_v27, %v292_v23 }
  0x88   :  { %v357_v21 = vsel %vm206_vm12, 1.0, %v438_v5 }
  0x89   :  { %386 = vmatmul.mubr.msk.f32.vlgmr.msra.gmra.mrb[2].mxu1 %vm209_vm11, %v357_v21 }
  0x8b   :  { %v301_v29 = vpop.permute.xlu1 %300 }
  0x8c   :  { %v307_v31 = vmul.f32 %v306_v28, %v301_v29 }
  0x8e   :  { %v308_v32 = vadd.f32 %v307_v31, %v298_v30 }
  0x90   :  { %v316_v38 = vadd.f32 %v360_v34, %v308_v32 }
 0x157   :  { %v197_v33 = vpop.f32.mrb[0].mxu1  ;;  %v112_v35 = vpop.f32.mrb[0].mxu0 }
 0x158   :  { %318 = vrot.lane.b32.xlu0 %v197_v33, %s443_s14  ;;  %v380_v36 = vpop.f32.mrb[1].mxu1  ;;  %v375_v37 = vpop.f32.mrb[1].mxu0 }
 0x15c   :  { %326 = vrot.lane.b32.xlu0 %v316_v38, %s444_s15  ;;  %v283_v39 = vpop.f32.mrb[2].mxu1 }
 0x15d   :  { %322 = vrot.lane.b32.xlu1 %v283_v39, %s445_s2  ;;  %v387_v40 = vpop.f32.mrb[3].mxu1 }
 0x1ca   :  { %v319_v41 = vpop.permute.xlu0 %318 }
 0x1cb   :  { %v330_v42 = vsel %vm329_vm13, %v112_v35, %v319_v41 }
 0x1ce   :  { %v327_v44 = vpop.permute.xlu0 %326 }
 0x1cf   :  { %v323_v43 = vpop.permute.xlu1 %322 }
 0x1d0   :  { %v332_v45 = vsel %vm331_vm14, %v330_v42, %v323_v43 }
 0x1d1   :  { %v334_v46 = vsel %vm333_vm15, %v332_v45, %v327_v44 }
 0x1d2   :  { %336 = vst.msk [vmem:[#allocation2] sm:$0xf] %vm335_vm0, %v334_v46 }
 0x1d3   :  { %423 = shalt.err (!%p420_p4)
}
 0x1d4   :  { %s424_s20 = scalar_lea.hbm %s538_s7, 64 }
 0x1d5   :  { %p425_p5 = scmp.ne.s32.totalorder %s538_s7, %s424_s20  ;;  %p428_p6 = scmp.lt.u32.totalorder %s424_s20, %s538_s7 }
 0x1d7   :  { %p430_p7 = pnand %p428_p6, %p425_p5 }
 0x1d9   :  { %433 = shalt.err (!%p430_p7)
}
 0x1da   :  { %346 = dma.vmem_to_hbm [thread:$0]  %s344_s17, 64, %s538_s7, [#allocation3]  }
 0x1db   :  { %434 = dma.done.wait [#allocation3], 64  }
 0x1dc   :  { %435 = vsyncadd [#allocation3], 4294967232 }
 0x1dd   :  { %350 = vsyncpa [#allocation3], 1 }

</bundles_post_ra>
